<compile_context>
chip_gen: v7x
topology: tpu7x:2x2x1
jax: 0.10.0
libtpu: 0.0.40
codegen_flags: <defaults>
</compile_context>

<pallas_src>
import jax
import jax.numpy as jnp
from jax.experimental import pallas as pl
from jax.experimental.pallas import tpu as pltpu


def mlp_kernel(x_ref, p_ref, b2_ref, o_ref):
    # x_ref : (1, N)          -- batch on the lane axis
    # p_ref : (n_hidden, 3)   -- col 0 = w1, col 1 = b1, col 2 = w2
    # b2_ref: (1, 1) in SMEM  -- scalar output bias
    # o_ref : (1, N)
    x = x_ref[...]                      # (1, N)
    w1 = p_ref[:, 0:1]                  # (n_hidden, 1)
    b1 = p_ref[:, 1:2]                  # (n_hidden, 1)
    w2 = p_ref[:, 2:3]                  # (n_hidden, 1)

    # hidden = relu(x @ W1 + b1), transposed: outer-product broadcast on the VPU.
    h = jnp.maximum(w1 * x + b1, 0.0)   # (n_hidden, N)

    # predict = h @ W2 + b2, transposed: scale rows then reduce over sublanes (XLU).
    out = jnp.sum(w2 * h, axis=0, keepdims=True)   # (1, N)
    o_ref[...] = (out + b2_ref[0, 0]).astype(o_ref.dtype)


def net_forward(x, w1, b1, w2, b2):
    """x: (N, 1); w1: (1, n_hidden); b1: (1, n_hidden); w2: (n_hidden, 1); b2: (1, 1)."""
    n, n_feature = x.shape
    n_hidden, n_output = w2.shape
    assert n_feature == 1 and n_output == 1, "kernel specialized to 1 -> n_hidden -> 1"

    x_t = x.T                                                   # (1, N), lane-dense
    params = jnp.concatenate([w1.T, b1.T, w2], axis=1)          # (n_hidden, 3)
    b2_s = b2.reshape(1, 1)

    out_t = pl.pallas_call(
        mlp_kernel,
        out_shape=jax.ShapeDtypeStruct((1, n), x.dtype),
        in_specs=[
            pl.BlockSpec(memory_space=pltpu.MemorySpace.VMEM),  # x_t
            pl.BlockSpec(memory_space=pltpu.MemorySpace.VMEM),  # packed w1/b1/w2
            pl.BlockSpec(memory_space=pltpu.MemorySpace.SMEM),  # scalar b2
        ],
        out_specs=pl.BlockSpec(memory_space=pltpu.MemorySpace.VMEM),
    )(x_t, params, b2_s)
    return out_t.T                                              # (N, 1)


def init_params(key, n_feature, n_hidden, n_output):
    # Mimics PyTorch Linear's U(-1/sqrt(fan_in), 1/sqrt(fan_in)) init.
    k1, k2, k3, k4 = jax.random.split(key, 4)
    lim1 = 1.0 / jnp.sqrt(jnp.float32(n_feature))
    lim2 = 1.0 / jnp.sqrt(jnp.float32(n_hidden))
    w1 = jax.random.uniform(k1, (n_feature, n_hidden), jnp.float32, -lim1, lim1)
    b1 = jax.random.uniform(k2, (1, n_hidden), jnp.float32, -lim1, lim1)
    w2 = jax.random.uniform(k3, (n_hidden, n_output), jnp.float32, -lim2, lim2)
    b2 = jax.random.uniform(k4, (1, n_output), jnp.float32, -lim2, lim2)
    return w1, b1, w2, b2


if __name__ == "__main__":
    # Mirrors the original script: x = linspace(-1, 1, 100).unsqueeze(1)
    N, n_feature, n_hidden, n_output = 100, 1, 10, 1

    key = jax.random.PRNGKey(0)
    w1, b1, w2, b2 = init_params(key, n_feature, n_hidden, n_output)
    x = jnp.linspace(-1.0, 1.0, N, dtype=jnp.float32).reshape(N, 1)

    out = jax.block_until_ready(net_forward(x, w1, b1, w2, b2))

    # Reference check in plain JAX.
    ref = jnp.maximum(x @ w1 + b1, 0.0) @ w2 + b2
    assert out.shape == (N, n_output)
    assert jnp.allclose(out, ref, atol=1e-5, rtol=1e-5)

    print("KERNEL_OK")
</pallas_src>

<mosaic_0001>
module attributes {stable_mosaic.version = 11 : i64} {
  func.func @mlp_kernel(%arg0: memref<1x100xf32, #tpu.memory_space<vmem>>, %arg1: memref<10x3xf32, #tpu.memory_space<vmem>>, %arg2: memref<1x1xf32, #tpu.memory_space<smem>>, %arg3: memref<1x100xf32, #tpu.memory_space<vmem>>) attributes {dimension_semantics = [], scalar_prefetch = 0 : i64, scratch_operands = 0 : i64, tpu.core_type = #tpu.core_type<tc>} {
    %c0 = arith.constant 0 : index
    %c0_0 = arith.constant 0 : index
    %0 = vector.load %arg0[%c0, %c0_0] : memref<1x100xf32, #tpu.memory_space<vmem>>, vector<1x100xf32>
    %c0_1 = arith.constant 0 : index
    %c0_2 = arith.constant 0 : index
    %1 = vector.load %arg1[%c0_1, %c0_2] : memref<10x3xf32, #tpu.memory_space<vmem>>, vector<10x1xf32>
    %c0_3 = arith.constant 0 : index
    %c1 = arith.constant 1 : index
    %2 = vector.load %arg1[%c0_3, %c1] : memref<10x3xf32, #tpu.memory_space<vmem>>, vector<10x1xf32>
    %c0_4 = arith.constant 0 : index
    %c2 = arith.constant 2 : index
    %3 = vector.load %arg1[%c0_4, %c2] : memref<10x3xf32, #tpu.memory_space<vmem>>, vector<10x1xf32>
    %4 = vector.broadcast %1 : vector<10x1xf32> to vector<10x100xf32>
    %5 = vector.broadcast %0 : vector<1x100xf32> to vector<10x100xf32>
    %6 = arith.mulf %4, %5 : vector<10x100xf32>
    %7 = vector.broadcast %2 : vector<10x1xf32> to vector<10x100xf32>
    %8 = arith.addf %6, %7 : vector<10x100xf32>
    %cst = arith.constant 0.000000e+00 : f32
    %9 = vector.broadcast %cst : f32 to vector<10x100xf32>
    %10 = arith.maximumf %8, %9 : vector<10x100xf32>
    %11 = vector.broadcast %3 : vector<10x1xf32> to vector<10x100xf32>
    %12 = arith.mulf %11, %10 : vector<10x100xf32>
    %cst_5 = arith.constant dense<0.000000e+00> : vector<100xf32>
    %13 = vector.multi_reduction <add>, %12, %cst_5 [0] : vector<10x100xf32> to vector<100xf32>
    %14 = vector.shape_cast %13 : vector<100xf32> to vector<1x100xf32>
    %c0_6 = arith.constant 0 : index
    %c0_7 = arith.constant 0 : index
    %15 = memref.load %arg2[%c0_6, %c0_7] : memref<1x1xf32, #tpu.memory_space<smem>>
    %16 = vector.broadcast %15 : f32 to vector<1x100xf32>
    %17 = arith.addf %14, %16 : vector<1x100xf32>
    %c0_8 = arith.constant 0 : index
    %c0_9 = arith.constant 0 : index
    %18 = vector.load %arg3[%c0_8, %c0_9] : memref<1x100xf32, #tpu.memory_space<vmem>>, vector<1x100xf32>
    tpu.vector_store %arg3[%c0_8, %c0_9], %17 {strides = array<i32>} : memref<1x100xf32, #tpu.memory_space<vmem>>, vector<1x100xf32>,
    return
  }
}

</mosaic_0001>

<bundles_post_ra>
// kernel: tpu_custom_call.1
= control target key start
LH: loop header
LB: loop body
LE: loop exit
PB: predicated region body
PF: predicated region fallthrough
CT: control target
= control target key end

     0   :  { %v122_v1 = vmov 1   ;;  %v123_v2 = vmov 0   ;;  %s170_s0 = inlined_call_operand.vmem [shape: f32[1,100], index: 0, kind: input, shape index: {}]   ;;  %s171_s1 = inlined_call_operand.vmem [shape: f32[10,3], index: 1, kind: input, shape index: {}]   ;;  %s172_s2 = inlined_call_operand.<no memory space> [shape: f32[1,1], index: 2, kind: input, shape index: {}]   ;;  %s173_s3 = inlined_call_operand.hbm [shape: f32[1,100], index: 3, kind: output, shape index: {}]  }
   0x1   :  { %v17_v0 = vld [vmem:[%s171_s1] sm:$0xff]  ;;  %95 = vset.pattern.permute.xlu1 %v122_v1  ;;  %94 = vset.pattern.permute.xlu0 %v123_v2 }
   0x2   :  { %9 = vsyncpa [#allocation4], 0  ;;  %38 = vperm.xlu1 %95, %v17_v0   ;;  %21 = vperm.xlu0 %94, %v17_v0   ;;  %v18_v3 = vld [vmem:[%s171_s1 + $0x8] sm:$0x3]  ;;  %v124_v4 = vmov 2   ;;  %vm59_vm0 = vcmask 818176   ;;  %v71_v28 = vstv %s172_s2 }
   0x3   :  { %v89_v5 = vld [vmem:[%s170_s0] ss:$0 sm:$0xff]  ;;  %vm61_vm1 = vcmask 812032   ;;  %s125_s18 = smov [#allocation3]   ;;  %vm73_vm2 = vcmask 811008  }
   0x4   :  { %s81_s19 = sshll.u32 %s125_s18, 4  ;;  %s82_s19 = int_to_ptr.vmem [resolvable:$true] %s81_s19 }
   0x5   :  { %s98_s20 = scalar_lea.vmem %s82_s19, 16  ;;  %s102_s21 = scalar_lea.vmem %s82_s19, 32 }
   0x6   :  { %42 = vperm.xlu1 %95, %v18_v3   ;;  %26 = vperm.xlu0 %94, %v18_v3   ;;  %p99_p0 = scmp.ne.s32.totalorder %s82_s19, %s98_s20  ;;  %p103_p1 = scmp.lt.s32.totalorder %s82_s19, %s82_s19 }
   0x7   :  { %p104_p2 = scmp.lt.s32.totalorder %s102_s21, %s98_s20 }
   0x9   :  { %p105_p3 = por %p104_p2, %p103_p1 }
   0xa   :  { %96 = vset.pattern.permute.xlu0 %v124_v4  ;;  %97 = vset.pattern.permute.xlu1 %v124_v4 }
   0xb   :  { %50 = vperm.xlu0 %96, %v17_v0   ;;  %54 = vperm.xlu1 %97, %v18_v3   ;;  %p106_p4 = pnand %p105_p3, %p99_p0 }
  0x81   :  { %v39_v6 = vpop.permute.xlu1 %38  ;;  %v22_v7 = vpop.permute.xlu0 %21 }
  0x82   :  { %v35_v8 = vmul.f32 %v89_v5, %v22_v7 }
  0x84   :  { %v45_v9 = vadd.f32 %v39_v6, %v35_v8 }
  0x85   :  { %v27_v10 = vpop.permute.xlu0 %26  ;;  %v43_v11 = vpop.permute.xlu1 %42 }
  0x86   :  { %v36_v12 = vmul.f32 %v89_v5, %v27_v10  ;;  %v47_v14 = vmax.f32 %v45_v9, 0.0 }
  0x88   :  { %v46_v13 = vadd.f32 %v43_v11, %v36_v12 }
  0x8a   :  { %v51_v15 = vpop.permute.xlu0 %50  ;;  %v55_v16 = vpop.permute.xlu1 %54  ;;  %v48_v17 = vmax.f32 %v46_v13, 0.0 }
  0x8b   :  { %v57_v18 = vmul.f32 %v51_v15, %v47_v14 }
  0x8c   :  { %v58_v19 = vmul.f32 %v55_v16, %v48_v17 }
  0x8d   :  { %v60_v20 = vsel %vm59_vm0, %v57_v18, 0.0 }
  0x8e   :  { %v62_v21 = vsel %vm61_vm1, %v58_v19, 0.0 }
  0x8f   :  { %v63_v22 = vadd.f32 %v62_v21, %v60_v20 }
  0x91   :  { %v64_v23 = vrot.slane %v63_v22, 4 }
  0x93   :  { %v65_v24 = vadd.f32 %v64_v23, %v63_v22 }
  0x95   :  { %v66_v25 = vrot.slane %v65_v24, 2 }
  0x97   :  { %v67_v26 = vadd.f32 %v66_v25, %v65_v24 }
  0x99   :  { %v68_v27 = vrot.slane %v67_v26, 1 }
  0x9b   :  { %v69_v29 = vadd.f32 %v68_v27, %v67_v26 }
  0x9d   :  { %v72_v30 = vadd.f32 %v71_v28, %v69_v29 }
  0x9f   :  { %74 = vst.msk [vmem:[#allocation3] sm:$0x1] %vm73_vm2, %v72_v30 }
  0xa0   :  { %109 = shalt.err (!%p106_p4)
}
  0xa1   :  { %s110_s24 = scalar_lea.hbm %s173_s3, 16 }
  0xa2   :  { %p111_p5 = scmp.ne.s32.totalorder %s173_s3, %s110_s24  ;;  %p114_p6 = scmp.lt.u32.totalorder %s110_s24, %s173_s3 }
  0xa4   :  { %p116_p7 = pnand %p114_p6, %p111_p5 }
  0xa6   :  { %119 = shalt.err (!%p116_p7)
}
  0xa7   :  { %84 = dma.vmem_to_hbm [thread:$0]  %s82_s19, 16, %s173_s3, [#allocation4]  }
  0xa8   :  { %120 = dma.done.wait [#allocation4], 16  }
  0xa9   :  { %121 = vsyncadd [#allocation4], 4294967280 }
  0xaa   :  { %88 = vsyncpa [#allocation4], 1 }

</bundles_post_ra>
